<compile_context>
chip_gen: v7x
topology: tpu7x:2x2x1
jax: 0.10.0
libtpu: 0.0.40
codegen_flags: <defaults>
</compile_context>

<pallas_src>
import math
import functools

import jax
import jax.numpy as jnp
from jax.experimental import pallas as pl
from jax.experimental.pallas import tpu as pltpu

# Per-input-buffer VMEM budget (bytes) used to size the lane tile; conservative
# so that 2x double-buffered input + output fit every TPU generation easily.
_TILE_BYTE_BUDGET = 4 * 1024 * 1024
_MAX_TILE_HW = 8192  # lanes; keeps per-grid-step latency reasonable


def _significance_kernel(x_ref, o_ref, *, a, c0):
    # x_ref: (1, C, TILE_HW) tile in the input's native dtype; upcast in VMEM.
    x = x_ref[...].astype(jnp.float32)

    # y = sum_c x^2 / 2  -> (1, 1, TILE_HW); sublane reduction (XLU slot).
    y = jnp.sum(x * x, axis=1, keepdims=True) * 0.5

    eps = 1e-8
    # ln_gamma_approx(a, y); identical formula and eps placement as the
    # PyTorch reference.
    ln_g = (
        (a - 1.0) * jnp.log(y + eps)
        - y
        + jnp.log(1.0 + (a - 1.0) / (y + eps) + (a - 1.0) * (a - 2.0) / (y * y + eps))
    )

    # relu(lgamma(C/2) - log(H*W) - ln_gamma_approx(C/2, y)); c0 folds the two
    # scalar constants at trace time.
    o_ref[...] = jnp.maximum(c0 - ln_g, 0.0)


def _choose_tile(hw: int, c: int, itemsize: int) -> int:
    """Pick the H*W lane-tile: full extent if small, else a multiple of 128."""
    if hw <= 128:
        return hw  # full extent is always a legal block dim
    # Largest multiple of 128 lanes whose input slab (C rows) fits the budget.
    max_lanes = (_TILE_BYTE_BUDGET // max(1, c * itemsize)) // 128 * 128
    max_lanes = max(128, min(max_lanes, _MAX_TILE_HW))
    if hw <= max_lanes:
        return hw
    return max_lanes


def significance(x: jax.Array) -> jax.Array:
    """Pallas equivalent of Significance().forward(x), x in NCHW -> (N, H, W)."""
    N, C, H, W = x.shape
    HW = H * W
    a = float(C) / 2.0
    c0 = math.lgamma(a) - math.log(float(HW))

    tile_hw = _choose_tile(HW, C, jnp.dtype(x.dtype).itemsize)
    num_tiles = pl.cdiv(HW, tile_hw)

    # Flatten spatial dims so H*W sits on the lane axis (free reshape:
    # row-major contiguous). Output kept 3-D (N, 1, HW) so the block's last
    # two dims are always layout-legal; reshaped back to (N, H, W) afterwards.
    x_flat = x.reshape(N, C, HW)

    kernel = functools.partial(_significance_kernel, a=a, c0=c0)

    out = pl.pallas_call(
        kernel,
        out_shape=jax.ShapeDtypeStruct((N, 1, HW), jnp.float32),
        grid_spec=pltpu.PrefetchScalarGridSpec(
            num_scalar_prefetch=0,
            grid=(N, num_tiles),
            in_specs=[
                pl.BlockSpec((1, C, tile_hw), lambda n, t: (n, 0, t)),
            ],
            out_specs=pl.BlockSpec((1, 1, tile_hw), lambda n, t: (n, 0, t)),
        ),
        compiler_params=pltpu.CompilerParams(
            dimension_semantics=("parallel", "parallel"),
            vmem_limit_bytes=32 * 1024 * 1024,
        ),
    )(x_flat)

    return out.reshape(N, H, W)


def _significance_ref(x: jax.Array) -> jax.Array:
    """Pure-JAX reference mirroring the PyTorch code, for correctness check."""
    N, C, H, W = x.shape
    xf = x.astype(jnp.float32)
    n_pixels = jnp.float32(H * W)
    a = jnp.float32(C / 2.0)
    y = jnp.sum(xf * xf, axis=1) / 2.0
    eps = 1e-8
    ln_g = (a - 1) * jnp.log(y + eps) - y + jnp.log(
        1 + (a - 1) / (y + eps) + (a - 1) * (a - 2) / (y * y + eps)
    )
    return jax.nn.relu(jax.lax.lgamma(a) - jnp.log(n_pixels) - ln_g)


if __name__ == "__main__":
    key = jax.random.PRNGKey(0)

    # Case 1: small shape consistent with the module spec (single full tile).
    N, C, H, W = 2, 4, 16, 16
    x = jax.random.normal(key, (N, C, H, W), dtype=jnp.float32)
    out = jax.block_until_ready(significance(x))
    ref = _significance_ref(x)
    assert out.shape == (N, H, W), out.shape
    assert jnp.allclose(out, ref, atol=1e-4, rtol=1e-4), float(
        jnp.max(jnp.abs(out - ref))
    )

    # Case 2: exercises the multi-tile / partial-last-block path.
    key2 = jax.random.PRNGKey(1)
    N2, C2, H2, W2 = 1, 8, 48, 48  # HW = 2304, not a multiple of the lane tile
    x2 = jax.random.normal(key2, (N2, C2, H2, W2), dtype=jnp.float32)
    # Force a small tile so multiple grid steps + a partial last block occur.
    x2_flat = x2.reshape(N2, C2, H2 * W2)
    tile_hw2 = 1024
    num_tiles2 = pl.cdiv(H2 * W2, tile_hw2)
    kernel2 = functools.partial(
        _significance_kernel,
        a=float(C2) / 2.0,
        c0=math.lgamma(C2 / 2.0) - math.log(float(H2 * W2)),
    )
    out2 = pl.pallas_call(
        kernel2,
        out_shape=jax.ShapeDtypeStruct((N2, 1, H2 * W2), jnp.float32),
        grid_spec=pltpu.PrefetchScalarGridSpec(
            num_scalar_prefetch=0,
            grid=(N2, num_tiles2),
            in_specs=[pl.BlockSpec((1, C2, tile_hw2), lambda n, t: (n, 0, t))],
            out_specs=pl.BlockSpec((1, 1, tile_hw2), lambda n, t: (n, 0, t)),
        ),
        compiler_params=pltpu.CompilerParams(
            dimension_semantics=("parallel", "parallel"),
            vmem_limit_bytes=32 * 1024 * 1024,
        ),
    )(x2_flat).reshape(N2, H2, W2)
    out2 = jax.block_until_ready(out2)
    ref2 = _significance_ref(x2)
    assert out2.shape == (N2, H2, W2), out2.shape
    assert jnp.allclose(out2, ref2, atol=1e-4, rtol=1e-4), float(
        jnp.max(jnp.abs(out2 - ref2))
    )

    # Case 3: bf16 input (native-dtype streaming, in-kernel upcast).
    x3 = x.astype(jnp.bfloat16)
    out3 = jax.block_until_ready(significance(x3))
    ref3 = _significance_ref(x3)
    assert jnp.allclose(out3, ref3, atol=2e-2, rtol=2e-2), float(
        jnp.max(jnp.abs(out3 - ref3))
    )

    print("KERNEL_OK")
</pallas_src>

<mosaic_0001>
module attributes {stable_mosaic.version = 11 : i64} {
  func.func @_significance_kernel(%arg0: i32, %arg1: i32, %arg2: memref<1x4x256xf32, #tpu.memory_space<vmem>>, %arg3: memref<1x1x256xf32, #tpu.memory_space<vmem>>) attributes {dimension_semantics = [#tpu.dimension_semantics<parallel>, #tpu.dimension_semantics<parallel>], iteration_bounds = array<i64: 2, 1>, scalar_prefetch = 0 : i64, scratch_operands = 0 : i64, tpu.core_type = #tpu.core_type<tc>, window_params = [{transform_indices = @transform_0, window_bounds = array<i64: 1, 4, 256>}, {transform_indices = @transform_1, window_bounds = array<i64: 1, 1, 256>}]} {
    %c0 = arith.constant 0 : index
    %c0_0 = arith.constant 0 : index
    %c0_1 = arith.constant 0 : index
    %0 = vector.load %arg2[%c0, %c0_0, %c0_1] : memref<1x4x256xf32, #tpu.memory_space<vmem>>, vector<1x4x256xf32>
    %1 = arith.mulf %0, %0 : vector<1x4x256xf32>
    %cst = arith.constant dense<0.000000e+00> : vector<1x256xf32>
    %2 = vector.multi_reduction <add>, %1, %cst [1] : vector<1x4x256xf32> to vector<1x256xf32>
    %3 = vector.shape_cast %2 : vector<1x256xf32> to vector<1x1x256xf32>
    %cst_2 = arith.constant 5.000000e-01 : f32
    %4 = vector.broadcast %cst_2 : f32 to vector<1x1x256xf32>
    %5 = arith.mulf %3, %4 : vector<1x1x256xf32>
    %cst_3 = arith.constant 9.99999993E-9 : f32
    %6 = vector.broadcast %cst_3 : f32 to vector<1x1x256xf32>
    %7 = arith.addf %5, %6 : vector<1x1x256xf32>
    %8 = math.log %7 : vector<1x1x256xf32>
    %cst_4 = arith.constant 1.000000e+00 : f32
    %9 = vector.broadcast %cst_4 : f32 to vector<1x1x256xf32>
    %10 = arith.mulf %9, %8 : vector<1x1x256xf32>
    %11 = arith.subf %10, %5 : vector<1x1x256xf32>
    %cst_5 = arith.constant 9.99999993E-9 : f32
    %12 = vector.broadcast %cst_5 : f32 to vector<1x1x256xf32>
    %13 = arith.addf %5, %12 : vector<1x1x256xf32>
    %cst_6 = arith.constant 1.000000e+00 : f32
    %14 = vector.broadcast %cst_6 : f32 to vector<1x1x256xf32>
    %15 = arith.divf %14, %13 : vector<1x1x256xf32>
    %cst_7 = arith.constant 1.000000e+00 : f32
    %16 = vector.broadcast %cst_7 : f32 to vector<1x1x256xf32>
    %17 = arith.addf %16, %15 : vector<1x1x256xf32>
    %18 = arith.mulf %5, %5 : vector<1x1x256xf32>
    %cst_8 = arith.constant 9.99999993E-9 : f32
    %19 = vector.broadcast %cst_8 : f32 to vector<1x1x256xf32>
    %20 = arith.addf %18, %19 : vector<1x1x256xf32>
    %cst_9 = arith.constant 0.000000e+00 : f32
    %21 = vector.broadcast %cst_9 : f32 to vector<1x1x256xf32>
    %22 = arith.divf %21, %20 : vector<1x1x256xf32>
    %23 = arith.addf %17, %22 : vector<1x1x256xf32>
    %24 = math.log %23 : vector<1x1x256xf32>
    %25 = arith.addf %11, %24 : vector<1x1x256xf32>
    %cst_10 = arith.constant -5.54517746 : f32
    %26 = vector.broadcast %cst_10 : f32 to vector<1x1x256xf32>
    %27 = arith.subf %26, %25 : vector<1x1x256xf32>
    %cst_11 = arith.constant 0.000000e+00 : f32
    %28 = vector.broadcast %cst_11 : f32 to vector<1x1x256xf32>
    %29 = arith.maximumf %27, %28 : vector<1x1x256xf32>
    %c0_12 = arith.constant 0 : index
    %c0_13 = arith.constant 0 : index
    %c0_14 = arith.constant 0 : index
    %30 = vector.load %arg3[%c0_12, %c0_13, %c0_14] : memref<1x1x256xf32, #tpu.memory_space<vmem>>, vector<1x1x256xf32>
    tpu.vector_store %arg3[%c0_12, %c0_13, %c0_14], %29 {strides = array<i32>} : memref<1x1x256xf32, #tpu.memory_space<vmem>>, vector<1x1x256xf32>,
    return
  }
  func.func @transform_0(%arg0: i32, %arg1: i32) -> (i32, i32, i32) {
    %c0_i32 = arith.constant 0 : i32
    %c0_i32_0 = arith.constant 0 : i32
    return %arg0, %c0_i32, %arg1 : i32, i32, i32
  }
  func.func @transform_1(%arg0: i32, %arg1: i32) -> (i32, i32, i32) {
    %c0_i32 = arith.constant 0 : i32
    %c0_i32_0 = arith.constant 0 : i32
    return %arg0, %c0_i32, %arg1 : i32, i32, i32
  }
}

</mosaic_0001>

<bundles_post_ra>
// kernel: tpu_custom_call.1
= control target key start
LH: loop header
LB: loop body
LE: loop exit
PB: predicated region body
PF: predicated region fallthrough
CT: control target
= control target key end

     0   :  { %6 = vsyncpa [#allocation3], 0  ;;  %s729_s0 = inlined_call_operand.hbm [shape: f32[2,4,256], index: 0, kind: input, shape index: {}]   ;;  %s730_s1 = inlined_call_operand.hbm [shape: f32[2,1,256], index: 1, kind: output, shape index: {}]  }
   0x1   :  { %8 = vsyncpa [#allocation3 + $0x1], 0 }
   0x2   :  { %9 = vsyncpa [#allocation4], 0 }
   0x3   :  { %11 = vsyncpa [#allocation4 + $0x1], 0  ;;  %s556_s6 = smov 0   ;;  %s558_s7 = smov 0  }
   0x4   :  { %s560_s8 = smov 0   ;;  %s562_s9 = smov 0  }
   0x5   :  { %s564_s10 = smov 0   ;;  %s566_s11 = smov 0  }
   0x6 LB: > { %s333_s12 = sadd.s32 4294967295, %s541_s11   ;;  %s334_s13 = sadd.s32 4294967294, %s541_s11   ;;  %s541_s11 = sphi %s566_s11, %s17_s11   ;;  %s537_s10 = sphi %s564_s10, %s746_s10   ;;  %s533_s9 = sphi %s562_s9, %s745_s9   ;;  %s529_s8 = sphi %s560_s8, %s744_s8   ;;  %s525_s7 = sphi %s558_s7, %s743_s7   ;;  %s521_s6 = sphi %s556_s6, %s742_s6  }
   0x7   : > { %s29_s14 = sadd.s32 1, %s537_s10  ;;  %s38_s15 = sadd.s32 1, %s529_s8 }
   0x8   : > { %p31_p0 = scmp.ge.s32.totalorder %s29_s14, 2  ;;  %p45_p1 = scmp.ne.s32.totalorder %s529_s8, %s525_s7 }
   0x9   : > { %p46_p2 = scmp.eq.s32.totalorder %s541_s11, 0  ;;  %p51_p3 = scmp.ne.s32.totalorder %s525_s7, %s521_s6 }
   0xa   : > { %s748_s14 = smov (%p31_p0, %s29_s14), 0  ;;  %p52_p5 = scmp.eq.s32.totalorder %s333_s12, 0 }
   0xb   : > { %p597_p4 = por %p46_p2, %p45_p1  ;;  %s33_s17 = ssub.s32 %s537_s10, %s748_s14 }
   0xc   : > { %p77_p6 = scmp.eq.s32.totalorder %s333_s12, 1  ;;  %p36_p7 = scmp.eq.s32.totalorder %s33_s17, 0 }
   0xd   : > { %p603_p8 = por %p52_p5, %p51_p3  ;;  %p83_p10 = scmp.eq.s32.totalorder %s334_s13, 1 }
   0xe   : > { %p607_p9 = por %p77_p6, %p45_p1  ;;  %p362_p13 = scmp.lt.s32.totalorder %s541_s11, 2 }
   0xf   : > { %s612_s20 = scalar_select %p36_p7, %s529_s8, %s38_s15  }
  0x10   : > { %s734_s19 = scalar_select %p607_p9, 1, 0 }
  0x11   : > { %p614_p11 = por %p83_p10, %p51_p3  ;;  %s103_s22 = sand.u32 1, %s529_s8  }
  0x12   : > { %s337_s23 = sshll.u32 %s103_s22, 3  ;;  %s348_s24 = sshll.u32 %s537_s10, 7 }
  0x13   : > { %s735_s21 = scalar_select %p614_p11, 1, 0 }
  0x14   : > { %s625_s27 = scalar_lea.hbm %s729_s0, %s348_s24  ;;  %s107_s28 = scalar_lea.vmem [#allocation2], %s337_s23 }
  0x15   : > { %s117_s29 = sshll.u32 %s107_s28, 4  ;;  %p631_p0 = pnand %p362_p13, %p597_p4  ;;  %s627_s29 = int_to_ptr.vmem [resolvable:$true] %s117_s29 }
  0x16   : > { %s104_s2 = scalar_lea.sflag [#allocation3], %s103_s22  ;;  %s429_s3 = scalar_lea.hbm %s625_s27, 128 }
  0x17   : > { %p430_p3 = scmp.ne.s32.totalorder %s625_s27, %s429_s3  ;;  %p431_p5 = pneg %p631_p0 }
  0x18   : > { %s434_s12 = scalar_lea.hbm %s729_s0, 256  ;;  %p435_p4 = scmp.lt.u32.totalorder %s625_s27, %s729_s0 }
  0x19   : > { %p432_p6 = pnand %p431_p5, %p430_p3  ;;  %p436_p10 = scmp.lt.u32.totalorder %s434_s12, %s429_s3 }
  0x1a   : > { %p438_p12 = scmp.lt.u32.totalorder %s429_s3, %s625_s27 }
  0x1b   : > { %p433_p7 = pneg %p432_p6  ;;  %p437_p13 = por %p436_p10, %p435_p4 }
  0x1d   : > { %p439_p1 = por %p438_p12, %p437_p13 }
  0x1f   : > { %p440_p2 = pnand %p439_p1, %p433_p7 }
  0x21   : > { %443 = shalt.err (!%p440_p2)
}
  0x22   : > { %s444_s16 = scalar_lea.vmem %s627_s29, 128  ;;  %s543_s17 = smov [#allocation2]  }
  0x23   : > { %p445_p3 = scmp.ne.s32.totalorder %s627_s29, %s444_s16  ;;  %s449_s22 = sshll.u32 %s543_s17, 4  ;;  %s450_s22 = int_to_ptr.vmem [resolvable:$false] %s449_s22 }
  0x24   : > { %s451_s23 = scalar_lea.vmem %s450_s22, 256  ;;  %p452_p9 = scmp.lt.s32.totalorder %s627_s29, %s450_s22 }
  0x25   : > { %p447_p6 = pnand %p445_p3, %p431_p5  ;;  %p453_p4 = scmp.lt.s32.totalorder %s451_s23, %s444_s16 }
  0x27   : > { %p448_p11 = pneg %p447_p6  ;;  %p454_p10 = por %p453_p4, %p452_p9 }
  0x29   : > { %p455_p12 = pnand %p454_p10, %p448_p11 }
  0x2b   : > { %458 = shalt.err (!%p455_p12)
}
  0x2c   : > { %357 = dma.hbm_to_vmem [thread:$0]  (!%p631_p0), %s625_s27, 128, %s627_s29, %s104_s2  }
  0x2d   : > { %p737_p1 = scmp.lt.s32.totalorder %s541_s11, 3  ;;  %p738_p2 = scmp.ge.s32.totalorder %s541_s11, 1 }
  0x2f   : > { %p123_p5 = pnand %p738_p2, %p737_p1 }
  0x30   : > { %s667_s24 = sand.u32 (!%p123_p5), 1, %s525_s7  }
  0x31   : > { %126 = sbr.rel (%p123_p5) target bundleno = 135 (0x87), region = 24  ;;  %s341_s25 = sshll.u32 (!%p123_p5), %s667_s24, 3 }
  0x32   : > { %s129_s26 = scalar_lea.sflag (!%p123_p5), [#allocation3], %s667_s24  ;;  %s132_s28 = scalar_lea.vmem (!%p123_p5), [#allocation2], %s341_s25 }
  0x38   : > { %512 = dma.done.wait (%p603_p8), %s129_s26, 128  }
  0x39   : > { %514 = vsyncadd (%p603_p8), %s129_s26, 4294967168  ;;  %v153_v0 = vld [vmem:[%s132_s28] sm:$0xff]  ;;  %vm158_vm0 = vcmask 1043456   ;;  %v544_v42 = vmov 1966171168   ;;  %v215_v44 = vlaneseq  ;;  %s342_s18 = sshll.u32 %s667_s24, 1 }
  0x3a   : > { %v154_v1 = vmul.f32 %v153_v0, %v153_v0  ;;  %v213_v43 = vunpack.c.l.s4 %v544_v42  ;;  %s150_s27 = scalar_lea.vmem [#allocation5], %s342_s18  ;;  %s349_s30 = sshll.u32 %s533_s9, 5 }
  0x3b   : > { %v216_v51 = vshrl.u32 %v215_v44, 7  ;;  %s249_s29 = sshll.u32 %s150_s27, 4  ;;  %vm229_vm1 = vcmp.lt.s32.totalorder %v215_v44, 256  ;;  %s682_s4 = scalar_lea.hbm %s730_s1, %s349_s30  ;;  %s677_s29 = int_to_ptr.vmem [resolvable:$true] %s249_s29 }
  0x3c   : > { %v156_v2 = vcombine.high %v154_v1, %v154_v1  ;;  %v159_v3 = vsel %vm158_vm0, %v154_v1, 0.0  ;;  %v214_v50 = vunpack.c.0.s8 %v213_v43  ;;  %s233_s5 = scalar_lea.sflag [#allocation4], %s667_s24  ;;  %s459_s12 = scalar_lea.vmem %s677_s29, 32 }
  0x3d   : > { %v160_v4 = vrot.slane %v159_v3, 4  ;;  %p460_p8 = scmp.ne.s32.totalorder %s677_s29, %s459_s12  ;;  %p739_p9 = scmp.ne.s32.totalorder %s734_s19, 0 }
  0x3e   : > { %v166_v5 = vsel %vm158_vm0, %v156_v2, 0.0  ;;  %v217_v56 = vsub.s32 %v214_v50, %v216_v51  ;;  %s545_s9 = smov [#allocation5]  }
  0x3f   : > { %v161_v6 = vadd.f32 %v160_v4, %v159_v3  ;;  %v167_v7 = vrot.slane %v166_v5, 4  ;;  %p461_p11 = pnand %p460_p8, %p739_p9  ;;  %s463_s13 = sshll.u32 %s545_s9, 4  ;;  %s464_s13 = int_to_ptr.vmem [resolvable:$false] %s463_s13 }
  0x40   : > { %s465_s15 = scalar_lea.vmem %s464_s13, 64  ;;  %p466_p7 = scmp.lt.s32.totalorder %s677_s29, %s464_s13 }
  0x41   : > { %v162_v8 = vrot.slane %v161_v6, 2  ;;  %v168_v9 = vadd.f32 %v167_v7, %v166_v5  ;;  %p462_p0 = pneg %p461_p11  ;;  %p467_p13 = scmp.lt.s32.totalorder %s465_s15, %s459_s12 }
  0x43   : > { %v163_v10 = vadd.f32 %v162_v8, %v161_v6  ;;  %v169_v11 = vrot.slane %v168_v9, 2  ;;  %p468_p3 = por %p467_p13, %p466_p7 }
  0x45   : > { %v164_v12 = vrot.slane %v163_v10, 1  ;;  %v170_v13 = vadd.f32 %v169_v11, %v168_v9  ;;  %p469_p6 = pnand %p468_p3, %p462_p0 }
  0x47   : > { %v165_v14 = vadd.f32 %v164_v12, %v163_v10  ;;  %v171_v15 = vrot.slane %v170_v13, 1 }
  0x49   : > { %v172_v16 = vadd.f32 %v171_v15, %v170_v13  ;;  %v173_v17 = vmul.f32 0.5, %v165_v14 }
  0x4b   : > { %v174_v18 = vmul.f32 0.5, %v172_v16  ;;  %v175_v19 = vadd.f32 1e-08, %v173_v17  ;;  %v189_v20 = vmul.f32 %v173_v17, %v173_v17 }
  0x4d   : > { %v176_v21 = vadd.f32 1e-08, %v174_v18  ;;  %v190_v22 = vmul.f32 %v174_v18, %v174_v18  ;;  %v191_v23 = vadd.f32 1e-08, %v189_v20  ;;  %413 = vrcp.f32 %v175_v19 }
  0x4f   : > { %v192_v24 = vadd.f32 1e-08, %v190_v22  ;;  %415 = vrcp.f32 %v176_v21 }
  0x50   : > { %417 = vrcp.f32 %v191_v23 }
  0x51   : > { %419 = vrcp.f32 %v192_v24 }
  0x52   : > { %421 = vlog2.f32 %v175_v19 }
  0x53   : > { %423 = vlog2.f32 %v176_v21 }
  0x57   : > { %v414_v25 = vpop.eup %413 }
  0x58   : > { %v187_v27 = vadd.f32 1.0, %v414_v25 }
  0x59   : > { %v416_v26 = vpop.eup %415 }
  0x5a   : > { %v418_v28 = vpop.eup %417  ;;  %v188_v29 = vadd.f32 1.0, %v416_v26 }
  0x5b   : > { %v420_v30 = vpop.eup %419  ;;  %v194_v31 = vmul.f32 0.0, %v418_v28 }
  0x5c   : > { %v196_v32 = vmul.f32 0.0, %v420_v30  ;;  %v422_v35 = vpop.eup %421 }
  0x5d   : > { %v197_v33 = vadd.f32 %v194_v31, %v187_v27  ;;  %v424_v36 = vpop.eup %423  ;;  %v178_v37 = vmul.f32 0.6931472, %v422_v35 }
  0x5e   : > { %v198_v34 = vadd.f32 %v196_v32, %v188_v29  ;;  %v180_v38 = vmul.f32 0.6931472, %v424_v36 }
  0x5f   : > { %425 = vlog2.f32 %v197_v33  ;;  %v181_v39 = vsub.f32 %v178_v37, %v173_v17 }
  0x60   : > { %427 = vlog2.f32 %v198_v34  ;;  %v182_v41 = vsub.f32 %v180_v38, %v174_v18 }
  0x69   : > { %v426_v40 = vpop.eup %425 }
  0x6a   : > { %v428_v45 = vpop.eup %427  ;;  %v200_v46 = vmul.f32 0.6931472, %v426_v40 }
  0x6b   : > { %v202_v47 = vmul.f32 0.6931472, %v428_v45 }
  0x6c   : > { %v203_v48 = vadd.f32 %v200_v46, %v181_v39 }
  0x6d   : > { %v204_v49 = vadd.f32 %v202_v47, %v182_v41 }
  0x6e   : > { %v205_v52 = vsub.f32 -5.5451775, %v203_v48 }
  0x6f   : > { %v206_v53 = vsub.f32 -5.5451775, %v204_v49 }
  0x70   : > { %v207_v54 = vmax.f32 %v205_v52, 0.0 }
  0x71   : > { %v208_v55 = vmax.f32 %v206_v53, 0.0 }
  0x73   : > { %v211_v57 = vcombine.low %v207_v54, %v208_v55 }
  0x75   : > { %v218_v58 = vrot.slane %v211_v57, %v217_v56 }
  0x77   : > { %v225_v59 = vrot.slane %v218_v58, %v217_v56 }
  0x79   : > { %231 = vst.msk [vmem:[%s150_s27] sm:$0x3] %vm229_vm1, %v225_v59 }
  0x7a   : > { %472 = shalt.err (!%p469_p6)
}
  0x7b   : > { %s473_s16 = scalar_lea.hbm %s682_s4, 32  ;;  %s477_s23 = scalar_lea.hbm %s730_s1, 64 }
  0x7c   : > { %p474_p4 = scmp.ne.s32.totalorder %s682_s4, %s473_s16  ;;  %p478_p1 = scmp.lt.u32.totalorder %s682_s4, %s730_s1 }
  0x7d   : > { %p479_p2 = scmp.lt.u32.totalorder %s477_s23, %s473_s16  ;;  %p481_p8 = scmp.lt.u32.totalorder %s473_s16, %s682_s4 }
  0x7e   : > { %p475_p10 = pnand %p474_p4, %p739_p9 }
  0x7f   : > { %p480_p5 = por %p479_p2, %p478_p1 }
  0x80   : > { %p476_p12 = pneg %p475_p10 }
  0x81   : > { %p482_p11 = por %p481_p8, %p480_p5 }
  0x83   : > { %p483_p0 = pnand %p482_p11, %p476_p12 }
  0x85   : > { %486 = shalt.err (!%p483_p0)
}
  0x86   : > { %352 = dma.vmem_to_hbm [thread:$0]  (%p739_p9), %s677_s29, 32, %s682_s4, %s233_s5  }
  0x87 PF: > { %s261_s26 = sand.u32 1, %s521_s6   ;;  %p740_p7 = scmp.ne.s32.totalorder %s735_s21, 0 }
  0x88   : > { %p741_p13 = scmp.ge.s32.totalorder %s541_s11, 2  ;;  %s262_s28 = scalar_lea.sflag [#allocation4], %s261_s26 }
  0x8a   : > { %p359_p3 = pnand %p741_p13, %p740_p7 }
  0x8c   : > { %516 = dma.done.wait (!%p359_p3), %s262_s28, 32  }
  0x8d   : > { %518 = vsyncadd (!%p359_p3), %s262_s28, 4294967264  ;;  %s17_s11 = sadd.s32 1, %s541_s11   ;;  %s742_s6 = smov %s525_s7 }
  0x8e   : > { %p14_p6 = scmp.ge.s32.totalorder %s17_s11, 4   ;;  %s743_s7 = smov %s529_s8 }
  0x8f   : > { %s744_s8 = smov %s612_s20  ;;  %s745_s9 = smov %s537_s10 }
  0x90   : > { %s746_s10 = smov %s748_s14  ;;  %16 = sbr.rel (!%p14_p6) target bundleno = 6 (0x6), region = 69 }
  0x97   :  { %267 = vsyncpa [#allocation3], 1 }
  0x98   :  { %269 = vsyncpa [#allocation3 + $0x1], 1 }
  0x99   :  { %270 = vsyncpa [#allocation4], 1 }
  0x9a   :  { %272 = vsyncpa [#allocation4 + $0x1], 1 }

</bundles_post_ra>
